<compile_context>
chip_gen: v5e
topology: v5e:2x2
jax: 0.10.0
libtpu: 0.0.40
codegen_flags: <defaults>
</compile_context>

<pallas_src>
import functools

import jax
import jax.numpy as jnp
from jax import lax
from jax.experimental import pallas as pl
from jax.experimental.pallas import tpu as pltpu

_LANE = 128
# Squeezed leading block dim: pl.Squeezed() where available, else the classic
# `None` sentinel (both give the kernel a (C, T) view).
_SQUEEZE = pl.Squeezed() if hasattr(pl, "Squeezed") else None


def _round_up(a, b):
    return (a + b - 1) // b * b


def _pow(x, power):
    """x**power, using VPU repeated-multiply for integer powers."""
    p = float(power)
    if p.is_integer():
        return lax.integer_pow(x, int(p))  # VPU multiplies, no EUP exp/log
    return x ** p  # fractional: exp(p*log(x)) on the EUP


def _power_softmax_kernel(x_ref, o_ref, *, power):
    # x_ref / o_ref: (C, T) tile; normalize over axis=0 (channels / sublanes).
    x = x_ref[...].astype(jnp.float32)  # accumulate in f32 even for bf16 I/O
    if power == 1:
        num = x
        denom = jnp.sum(jnp.abs(x), axis=0, keepdims=True)
        denom = jnp.maximum(denom, 1e-12)  # F.normalize eps
    else:
        num = _pow(x, power)
        # No eps clamp: matches the PyTorch reference (0/0 -> NaN on an
        # all-zero channel column).
        denom = jnp.sum(num, axis=0, keepdims=True)
    # One reciprocal per lane column instead of C divides per column.
    inv = pl.reciprocal(denom, approx=False)
    o_ref[...] = (num * inv).astype(o_ref.dtype)


def _choose_tile(C, HW, itemsize):
    """Pick a lane-dense tile width T (multiple of 128).

    Minimizes (padded HBM traffic + per-grid-step pipeline overhead) while
    keeping the 2 arrays x 2 pipeline buffers under ~8 MiB of VMEM.
    """
    budget_bytes = 8 * 1024 * 1024
    cap = budget_bytes // (4 * C * itemsize)          # 2 arrays x 2 buffers
    cap = max(_LANE, min(4096, (cap // _LANE) * _LANE))
    hw128 = _round_up(HW, _LANE)
    if hw128 <= cap:
        return hw128                                  # one tile per batch row
    # Per-step pipeline overhead (~0.35 us) expressed in HBM-byte equivalents.
    step_cost = 256 * 1024
    best_t, best_cost = _LANE, None
    for t in range(cap, _LANE - 1, -_LANE):           # prefer larger T on ties
        hw_pad = _round_up(HW, t)
        cost = 2 * (hw_pad - HW) * C * itemsize + (hw_pad // t) * step_cost
        if best_cost is None or cost < best_cost:
            best_t, best_cost = t, cost
    return best_t


def power_softmax(x, power, dim=1):
    """PowerSoftmax forward. x: (N, C, ...), normalization over `dim` (=1)."""
    assert dim == 1, "kernel specialized for channel-dim normalization (dim=1)"
    orig_shape = x.shape
    N, C = orig_shape[0], orig_shape[1]
    HW = 1
    for d in orig_shape[2:]:
        HW *= d

    itemsize = jnp.dtype(x.dtype).itemsize
    T = _choose_tile(C, HW, itemsize)
    HW_pad = _round_up(HW, T)

    xr = x.reshape(N, C, HW)
    if HW_pad != HW:
        # Pad with ones: keeps padded columns finite (denom = C); sliced off
        # below.  Channel normalization is per-column, so real outputs are
        # unaffected.
        pad = jnp.ones((N, C, HW_pad - HW), dtype=x.dtype)
        xr = jnp.concatenate([xr, pad], axis=2)

    kernel = functools.partial(_power_softmax_kernel, power=power)

    elems = N * C * HW_pad
    is_int_power = float(power).is_integer()
    cost = pl.CostEstimate(
        flops=3 * elems,
        transcendentals=0 if is_int_power else 2 * elems,
        bytes_accessed=2 * elems * itemsize,
    )

    block = (_SQUEEZE, C, T)  # kernel sees a (C, T) tile, lane axis dense
    out = pl.pallas_call(
        kernel,
        out_shape=jax.ShapeDtypeStruct((N, C, HW_pad), x.dtype),
        grid_spec=pltpu.PrefetchScalarGridSpec(
            num_scalar_prefetch=0,
            grid=(N, HW_pad // T),
            in_specs=[pl.BlockSpec(block, lambda n, t: (n, 0, t))],
            out_specs=pl.BlockSpec(block, lambda n, t: (n, 0, t)),
        ),
        compiler_params=pltpu.CompilerParams(
            dimension_semantics=("parallel", "parallel"),
        ),
        cost_estimate=cost,
    )(xr)

    if HW_pad != HW:
        out = out[:, :, :HW]
    return out.reshape(orig_shape)


def power_softmax_ref(x, power, dim=1):
    if power == 1:
        denom = jnp.maximum(jnp.sum(jnp.abs(x), axis=dim, keepdims=True), 1e-12)
        return x / denom
    px = x ** power
    return px / jnp.sum(px, axis=dim, keepdims=True)


if __name__ == "__main__":
    key = jax.random.PRNGKey(0)
    N, C, H, W = 2, 4, 16, 16
    # Positive inputs (NNMF context uses non-negative activations).
    x = jax.random.uniform(key, (N, C, H, W), dtype=jnp.float32) + 0.1

    # power = 2 (integer fast path: VPU square, no EUP)
    out2 = jax.block_until_ready(power_softmax(x, power=2, dim=1))
    ref2 = power_softmax_ref(x, power=2, dim=1)
    assert jnp.allclose(out2, ref2, atol=1e-5, rtol=1e-5), "power=2 mismatch"

    # power = 1 (F.normalize p=1 branch)
    out1 = jax.block_until_ready(power_softmax(x, power=1, dim=1))
    ref1 = power_softmax_ref(x, power=1, dim=1)
    assert jnp.allclose(out1, ref1, atol=1e-5, rtol=1e-5), "power=1 mismatch"

    # fractional power (EUP exp/log path), positive inputs only
    outf = jax.block_until_ready(power_softmax(x, power=1.5, dim=1))
    reff = power_softmax_ref(x, power=1.5, dim=1)
    assert jnp.allclose(outf, reff, atol=1e-5, rtol=1e-4), "power=1.5 mismatch"

    # H*W not a multiple of 128 exercises the lane-padding path
    x_odd = jax.random.uniform(jax.random.PRNGKey(1), (2, 4, 10, 10),
                               dtype=jnp.float32) + 0.1
    outo = jax.block_until_ready(power_softmax(x_odd, power=2, dim=1))
    refo = power_softmax_ref(x_odd, power=2, dim=1)
    assert jnp.allclose(outo, refo, atol=1e-5, rtol=1e-5), "padded-HW mismatch"

    # bf16 I/O (halves HBM traffic); reduction still accumulates in f32
    xb = x.astype(jnp.bfloat16)
    outb = jax.block_until_ready(power_softmax(xb, power=2, dim=1))
    refb = power_softmax_ref(xb.astype(jnp.float32), power=2, dim=1)
    assert jnp.allclose(outb.astype(jnp.float32), refb,
                        atol=2e-2, rtol=2e-2), "bf16 mismatch"

    print("KERNEL_OK")
</pallas_src>

<mosaic_0001>
module attributes {stable_mosaic.version = 11 : i64} {
  func.func @_power_softmax_kernel(%arg0: i32, %arg1: i32, %arg2: memref<1x4x256xf32, #tpu.memory_space<vmem>>, %arg3: memref<1x4x256xf32, #tpu.memory_space<vmem>>) attributes {dimension_semantics = [#tpu.dimension_semantics<parallel>, #tpu.dimension_semantics<parallel>], iteration_bounds = array<i64: 2, 1>, scalar_prefetch = 0 : i64, scratch_operands = 0 : i64, tpu.core_type = #tpu.core_type<tc>, window_params = [{transform_indices = @transform_0, window_bounds = array<i64: 1, 4, 256>}, {transform_indices = @transform_1, window_bounds = array<i64: 1, 4, 256>}]} {
    %c0 = arith.constant 0 : index
    %c0_0 = arith.constant 0 : index
    %c0_1 = arith.constant 0 : index
    %0 = vector.load %arg2[%c0, %c0_0, %c0_1] : memref<1x4x256xf32, #tpu.memory_space<vmem>>, vector<1x4x256xf32>
    %1 = vector.shape_cast %0 : vector<1x4x256xf32> to vector<4x256xf32>
    %2 = arith.mulf %1, %1 : vector<4x256xf32>
    %cst = arith.constant dense<0.000000e+00> : vector<256xf32>
    %3 = vector.multi_reduction <add>, %2, %cst [0] : vector<4x256xf32> to vector<256xf32>
    %4 = vector.shape_cast %3 : vector<256xf32> to vector<1x256xf32>
    %5 = tpu.reciprocal %4 : vector<1x256xf32> -> vector<1x256xf32>
    %6 = vector.broadcast %5 : vector<1x256xf32> to vector<4x256xf32>
    %7 = arith.mulf %2, %6 : vector<4x256xf32>
    %c0_2 = arith.constant 0 : index
    %c0_3 = arith.constant 0 : index
    %c0_4 = arith.constant 0 : index
    %8 = vector.load %arg3[%c0_2, %c0_3, %c0_4] : memref<1x4x256xf32, #tpu.memory_space<vmem>>, vector<1x4x256xf32>
    %9 = vector.shape_cast %8 : vector<1x4x256xf32> to vector<4x256xf32>
    %10 = vector.shape_cast %7 : vector<4x256xf32> to vector<1x4x256xf32>
    tpu.vector_store %arg3[%c0_2, %c0_3, %c0_4], %10 {strides = array<i32>} : memref<1x4x256xf32, #tpu.memory_space<vmem>>, vector<1x4x256xf32>,
    return
  }
  func.func @transform_0(%arg0: i32, %arg1: i32) -> (i32, i32, i32) {
    %c0_i32 = arith.constant 0 : i32
    %c0_i32_0 = arith.constant 0 : i32
    return %arg0, %c0_i32, %arg1 : i32, i32, i32
  }
  func.func @transform_1(%arg0: i32, %arg1: i32) -> (i32, i32, i32) {
    %c0_i32 = arith.constant 0 : i32
    %c0_i32_0 = arith.constant 0 : i32
    return %arg0, %c0_i32, %arg1 : i32, i32, i32
  }
}

</mosaic_0001>

<bundles_post_ra>
// kernel: tpu_custom_call.1
= control target key start
LH: loop header
LB: loop body
LE: loop exit
PB: predicated region body
PF: predicated region fallthrough
CT: control target
= control target key end

     0   :  { %6 = vsyncpa [#allocation3], 0  ;;  %s656_s0 = inlined_call_operand.hbm [shape: f32[2,4,256], index: 0, kind: input, shape index: {}]   ;;  %s657_s1 = inlined_call_operand.hbm [shape: f32[2,4,256], index: 1, kind: output, shape index: {}]  }
   0x1   :  { %8 = vsyncpa [#allocation3 + $0x1], 0 }
   0x2   :  { %9 = vsyncpa [#allocation4], 0 }
   0x3   :  { %11 = vsyncpa [#allocation4 + $0x1], 0  ;;  %s523_s6 = smov 0   ;;  %s525_s7 = smov 0  }
   0x4   :  { %s527_s8 = smov 0   ;;  %s529_s9 = smov 0  }
   0x5   :  { %s531_s10 = smov 0   ;;  %s533_s11 = smov 0  }
   0x6 LB: > { %s316_s12 = sadd.s32 4294967295, %s511_s11   ;;  %s317_s13 = sadd.s32 4294967294, %s511_s11   ;;  %s511_s11 = sphi %s533_s11, %s17_s11   ;;  %s507_s10 = sphi %s531_s10, %s668_s10   ;;  %s503_s9 = sphi %s529_s9, %s667_s9   ;;  %s499_s8 = sphi %s527_s8, %s666_s8   ;;  %s495_s7 = sphi %s525_s7, %s665_s7   ;;  %s491_s6 = sphi %s523_s6, %s664_s6  }
   0x7   : > { %s29_s14 = sadd.s32 1, %s507_s10  ;;  %s38_s15 = sadd.s32 1, %s499_s8 }
   0x8   : > { %p31_p0 = scmp.ge.s32.totalorder %s29_s14, 2  ;;  %p45_p1 = scmp.ne.s32.totalorder %s499_s8, %s495_s7 }
   0x9   : > { %p46_p2 = scmp.eq.s32.totalorder %s511_s11, 0  ;;  %p51_p3 = scmp.ne.s32.totalorder %s495_s7, %s491_s6 }
   0xa   : > { %s670_s14 = smov (%p31_p0, %s29_s14), 0  ;;  %p52_p5 = scmp.eq.s32.totalorder %s316_s12, 0 }
   0xb   : > { %p564_p4 = por %p46_p2, %p45_p1  ;;  %s33_s17 = ssub.s32 %s507_s10, %s670_s14 }
   0xc   : > { %p77_p6 = scmp.eq.s32.totalorder %s316_s12, 1  ;;  %p36_p7 = scmp.eq.s32.totalorder %s33_s17, 0 }
   0xd   : > { %p570_p8 = por %p52_p5, %p51_p3  ;;  %p83_p10 = scmp.eq.s32.totalorder %s317_s13, 1 }
   0xe   : > { %p574_p9 = por %p77_p6, %p45_p1  ;;  %p319_p12 = scmp.ge.s32.totalorder %s511_s11, 2 }
   0xf   : > { %s579_s20 = scalar_select %p36_p7, %s499_s8, %s38_s15  }
  0x10   : > { %p581_p11 = por %p83_p10, %p51_p3  ;;  %p345_p13 = scmp.lt.s32.totalorder %s511_s11, 2 }
  0x11   : > { %s103_s22 = sand.u32 1, %s499_s8   ;;  %s331_s24 = sshll.u32 %s507_s10, 3 }
  0x12   : > { %s320_s23 = sshll.u32 %s103_s22, 3  ;;  %s114_s27 = scalar_lea.hbm %s656_s0, %s331_s24 }
  0x13   : > { %s107_s28 = scalar_lea.vmem [#allocation2], %s320_s23  ;;  %s116_s30 = sshll.u32 %s114_s27, 4  ;;  %s117_s30 = int_to_ptr.hbm [resolvable:$true] %s116_s30 }
  0x14   : > { %s118_s29 = sshll.u32 %s107_s28, 4  ;;  %p338_p0 = pnand %p345_p13, %p564_p4  ;;  %s119_s29 = int_to_ptr.vmem [resolvable:$true] %s118_s29 }
  0x15   : > { %p323_p1 = scmp.ge.s32.totalorder %s511_s11, 1  ;;  %p123_p2 = scmp.lt.s32.totalorder %s511_s11, 3 }
  0x16   : > { %s104_s2 = scalar_lea.sflag [#allocation3], %s103_s22 }
  0x17   : > { %340 = dma.hbm_to_vmem [thread:$0]  (!%p338_p0), %s117_s30, 128, %s119_s29, %s104_s2  }
  0x18   : > { %p124_p3 = pnand %p323_p1, %p123_p2 }
  0x19   : > { %s597_s3 = sand.u32 (!%p124_p3), 1, %s495_s7  }
  0x1a   : > { %127 = sbr.rel (%p124_p3) target bundleno = 82 (0x52), region = 24  ;;  %s324_s4 = sshll.u32 (!%p124_p3), %s597_s3, 3 }
  0x1b   : > { %s130_s5 = scalar_lea.sflag (!%p124_p3), [#allocation3], %s597_s3  ;;  %s133_s12 = scalar_lea.vmem (!%p124_p3), [#allocation2], %s324_s4 }
  0x1f   : > { %482 = dma.done.wait (%p570_p8), %s130_s5, 128  }
  0x20   : > { %484 = vsyncadd (%p570_p8), %s130_s5, 4294967168  ;;  %v155_v0 = vld [vmem:[%s133_s12] sm:$0xff]  ;;  %vm163_vm0 = vcmask 1043456   ;;  %s332_s13 = sshll.u32 %s503_s9, 3  ;;  %s152_s9 = scalar_lea.vmem [#allocation5], %s324_s4 }
  0x21   : > { %v156_v1 = vmul.f32 %v155_v0, %v155_v0  ;;  %s227_s17 = scalar_lea.hbm %s657_s1, %s332_s13  ;;  %s229_s18 = sshll.u32 %s152_s9, 4  ;;  %s230_s18 = int_to_ptr.vmem [resolvable:$true] %s229_s18 }
  0x22   : > { %s231_s22 = sshll.u32 %s227_s17, 4  ;;  %s214_s23 = scalar_lea.sflag [#allocation4], %s597_s3  ;;  %s232_s22 = int_to_ptr.hbm [resolvable:$true] %s231_s22 }
  0x23   : > { %158 = vst [vmem:[#allocation1] ss:$2 sm:$0xff] %v156_v1  ;;  %s443_s24 = sshra.s32 %s232_s22, 4  ;;  %s449_s28 = scalar_lea.hbm %s657_s1, 16  ;;  %s444_s24 = int_to_ptr.hbm [resolvable:$true] %s443_s24 }
  0x24   : > { %s445_s25 = scalar_lea.hbm %s444_s24, 8  ;;  %p450_p7 = scmp.lt.s32.totalorder %s444_s24, %s657_s1 }
  0x25   : > { %p446_p4 = scmp.ne.s32.totalorder %s444_s24, %s445_s25  ;;  %p451_p8 = scmp.lt.s32.totalorder %s449_s28, %s445_s25 }
  0x27   : > { %p447_p5 = pnand %p446_p4, %p574_p9  ;;  %p452_p10 = por %p451_p8, %p450_p7 }
  0x29   : > { %p448_p6 = pneg %p447_p5 }
  0x2a   : > { %v159_v2 = vld.sshfl [vmem:[#allocation1] sm:$0xff pattern:$0x75316420]  ;;  %v160_v3 = vld.sshfl [vmem:[#allocation1 + $0x8] sm:$0xff pattern:$0x75316420] }
  0x2b   : > { %v164_v4 = vsel %vm163_vm0, %v159_v2, 0.0  ;;  %v171_v5 = vsel %vm163_vm0, %v160_v3, 0.0  ;;  %p453_p13 = pnand %p452_p10, %p448_p6 }
  0x2c   : > { %v165_v6 = vrot.slane %v164_v4, 4  ;;  %v172_v7 = vrot.slane %v171_v5, 4 }
  0x2e   : > { %v166_v8 = vadd.f32 %v165_v6, %v164_v4  ;;  %v173_v9 = vadd.f32 %v172_v7, %v171_v5 }
  0x30   : > { %v167_v10 = vrot.slane %v166_v8, 2  ;;  %v174_v11 = vrot.slane %v173_v9, 2 }
  0x32   : > { %v168_v12 = vadd.f32 %v167_v10, %v166_v8  ;;  %v175_v13 = vadd.f32 %v174_v11, %v173_v9 }
  0x34   : > { %v169_v14 = vrot.slane %v168_v12, 1  ;;  %v176_v15 = vrot.slane %v175_v13, 1 }
  0x36   : > { %v170_v16 = vadd.f32 %v169_v14, %v168_v12  ;;  %v177_v17 = vadd.f32 %v176_v15, %v175_v13 }
  0x38   : > { %395 = vrcp.f32 %v170_v16  ;;  %v203_v25 = vand.u32 2147483648, %v177_v17  ;;  %v201_v27 = vand.u32 2147483647, %v177_v17  ;;  %vm183_vm3 = vweird.f32 %v170_v16 }
  0x39   : > { %397 = vrcp.f32 %v177_v17  ;;  %v189_v29 = vand.u32 2147483648, %v170_v16  ;;  %v187_v31 = vand.u32 2147483647, %v170_v16  ;;  %vm197_vm5 = vweird.f32 %v177_v17 }
  0x3a   : > { %v204_v33 = vor.u32 1.1754944e-38, %v203_v25  ;;  %vm202_vm7 = vcmp.eq.f32.partialorder %v201_v27, 8.507059e+37 }
  0x3b   : > { %v190_v36 = vor.u32 1.1754944e-38, %v189_v29  ;;  %vm188_vm8 = vcmp.eq.f32.partialorder %v187_v31, 8.507059e+37 }
  0x3e   : > { %v396_v18 = vpop.eup %395 }
  0x3f   : > { %v398_v19 = vpop.eup %397  ;;  %v179_v20 = vmul.f32 %v396_v18, %v170_v16  ;;  %vm184_vm1 = vweird.f32 %v396_v18 }
  0x40   : > { %v193_v21 = vmul.f32 %v398_v19, %v177_v17  ;;  %vm198_vm2 = vweird.f32 %v398_v19  ;;  %vm610_vm4 = vmor %vm183_vm3, %vm184_vm1 }
  0x41   : > { %v180_v22 = vsub.f32 1.0, %v179_v20  ;;  %vm199_vm6 = vmor %vm197_vm5, %vm198_vm2 }
  0x42   : > { %v194_v23 = vsub.f32 1.0, %v193_v21 }
  0x43   : > { %v181_v24 = vmul.f32 %v396_v18, %v180_v22 }
  0x44   : > { %v195_v26 = vmul.f32 %v398_v19, %v194_v23 }
  0x45   : > { %v182_v28 = vadd.f32 %v396_v18, %v181_v24 }
  0x46   : > { %v196_v32 = vadd.f32 %v398_v19, %v195_v26 }
  0x47   : > { %v186_v34 = vsel %vm610_vm4, %v396_v18, %v182_v28 }
  0x48   : > { %v200_v35 = vsel %vm199_vm6, %v398_v19, %v196_v32  ;;  %v191_v39 = vsel %vm188_vm8, %v190_v36, %v186_v34 }
  0x49   : > { %v205_v37 = vsel %vm202_vm7, %v204_v33, %v200_v35 }
  0x4a   : > { %v208_v38 = vrot.slane %v205_v37, 4 }
  0x4c   : > { %v209_v40 = vsel %vm163_vm0, %v191_v39, %v208_v38 }
  0x4d   : > { %v211_v41 = vmul.f32 %v209_v40, %v156_v1 }
  0x4f   : > { %212 = vst [vmem:[%s152_s9] sm:$0xff] %v211_v41 }
  0x50   : > { %456 = shalt.err (!%p453_p13)
}
  0x51   : > { %335 = dma.vmem_to_hbm [thread:$0]  (%p574_p9), %s230_s18, 128, %s232_s22, %s214_s23  }
  0x52 PF: > { %s243_s2 = sand.u32 1, %s491_s6   ;;  %p342_p0 = pnand %p319_p12, %p581_p11 }
  0x53   : > { %s244_s3 = scalar_lea.sflag [#allocation4], %s243_s2 }
  0x54   : > { %p343_p1 = pneg %p342_p0 }
  0x56   : > { %486 = dma.done.wait (%p343_p1), %s244_s3, 128  }
  0x57   : > { %488 = vsyncadd (%p343_p1), %s244_s3, 4294967168  ;;  %s17_s11 = sadd.s32 1, %s511_s11   ;;  %s664_s6 = smov %s495_s7 }
  0x58   : > { %p14_p2 = scmp.ge.s32.totalorder %s17_s11, 4   ;;  %s665_s7 = smov %s499_s8 }
  0x59   : > { %s666_s8 = smov %s579_s20  ;;  %s667_s9 = smov %s507_s10 }
  0x5a   : > { %s668_s10 = smov %s670_s14  ;;  %16 = sbr.rel (!%p14_p2) target bundleno = 6 (0x6), region = 69 }
  0x5f   :  { %250 = vsyncpa [#allocation3], 1 }
  0x60   :  { %252 = vsyncpa [#allocation3 + $0x1], 1 }
  0x61   :  { %253 = vsyncpa [#allocation4], 1 }
  0x62   :  { %255 = vsyncpa [#allocation4 + $0x1], 1 }

</bundles_post_ra>
